<compile_context>
chip_gen: v7x
topology: tpu7x:2x2x1
jax: 0.10.0
libtpu: 0.0.40
codegen_flags: <defaults>
</compile_context>

<pallas_src>
import jax
import jax.numpy as jnp
from jax.experimental import pallas as pl
from jax.experimental.pallas import tpu as pltpu


def _unnormalize_kernel(x_ref, std_ref, mean_ref, o_ref):
    # x_ref/o_ref block: (TM, TN); std_ref/mean_ref block: (TM, 1) float32.
    s = std_ref[...]                      # (TM, 1) f32, broadcasts over lanes
    m = mean_ref[...]                     # (TM, 1) f32
    x = x_ref[...].astype(jnp.float32)    # compute in f32, cast on store
    o_ref[...] = (x * s + m).astype(o_ref.dtype)


def _round_up(v: int, m: int) -> int:
    return ((v + m - 1) // m) * m


def _tpu_budgets() -> tuple[int, int]:
    """(target block bytes, vmem_limit_bytes) tuned per TPU generation.

    v4/v5e/v6e (128 MiB physical VMEM): ~12 MiB blocks, 64 MiB scoped limit.
    v7x-class  (64 MiB VMEM per TC):    ~8 MiB blocks,  44 MiB scoped limit.
    Unknown chips fall back to the conservative (v7x) setting.
    """
    kind = ""
    try:
        kind = jax.devices()[0].device_kind.lower()
    except Exception:
        pass
    big_vmem = ("v4" in kind) or ("v5" in kind) or ("v6" in kind)
    if not big_vmem:
        try:
            big_vmem = int(pltpu.get_tpu_info().vmem_capacity_bytes) >= (96 << 20)
        except Exception:
            big_vmem = False
    if big_vmem:
        return 12 << 20, 64 << 20
    return 8 << 20, 44 << 20


_MAX_ROW_TILE = 2048   # bounds the lane-padded (tm, 1) mean/std VMEM buffers


def _pick_tiles(rows: int, cols: int, itemsize: int, target_bytes: int):
    """Jointly budgeted (tm, tn): tm*tn*itemsize ~<= target_bytes, sublane/lane
    aligned, with enough total blocks for pipelining + both v7x TensorCores."""
    sub = max(8, 32 // itemsize)          # native sublane tile: 8 f32, 16 bf16, 32 i8/fp8
    lane = 128
    total = rows * cols * itemsize

    # Minimum number of grid steps we want.
    want = pl.cdiv(total, target_bytes)                 # VMEM budget
    want = max(want, 4 if total >= (1 << 20) else 2)    # overlap + 2 TCs (if splittable)

    # Split rows first: a (tm, cols) block is a single contiguous HBM transfer.
    if rows <= sub:
        tm = rows                                       # full extent (exempt from x8 rule)
    else:
        n_row = min(want, pl.cdiv(rows, sub))           # >= 2 whenever rows > sub
        tm = min(_round_up(pl.cdiv(rows, n_row), sub), _MAX_ROW_TILE)
        if tm >= rows:
            tm = rows                                   # full extent is always legal
    n_row = pl.cdiv(rows, tm)

    # Split columns for whatever budget / block count is still missing.
    n_col = max(pl.cdiv(tm * cols * itemsize, target_bytes), pl.cdiv(want, n_row))
    if n_col > 1 and cols >= 2 * lane:
        tn = min(_round_up(pl.cdiv(cols, n_col), lane), cols)   # multiple of 128
    else:
        tn = cols                                       # full extent (lane-dense or exempt)
    return tm, tn


def unnormalize(x: jax.Array, mean: jax.Array, std: jax.Array, *,
                inplace: bool = False) -> jax.Array:
    """y = x * std + mean  (UnNormalize.forward).

    x:    (N, C, H, W)
    mean: (C,) or (1, C, 1, 1)
    std:  (C,) or (1, C, 1, 1)
    inplace=True aliases the output onto x (useful only if the caller donates x).
    """
    N, C, H, W = x.shape
    rows, cols = N * C, H * W
    itemsize = jnp.dtype(x.dtype).itemsize

    # Per-row (= per (n, c) plane) constants, kept in float32 for the FMA.
    mean_f = jnp.asarray(mean).reshape(-1).astype(jnp.float32)
    std_f = jnp.asarray(std).reshape(-1).astype(jnp.float32)
    mean_rows = jnp.broadcast_to(mean_f.reshape(1, C), (N, C)).reshape(rows, 1)
    std_rows = jnp.broadcast_to(std_f.reshape(1, C), (N, C)).reshape(rows, 1)

    # Lane-dense 2D view of the data.
    x2 = x.reshape(rows, cols)

    target_bytes, vmem_limit = _tpu_budgets()
    tm, tn = _pick_tiles(rows, cols, itemsize, target_bytes)
    grid = (pl.cdiv(rows, tm), pl.cdiv(cols, tn))

    y2 = pl.pallas_call(
        _unnormalize_kernel,
        out_shape=jax.ShapeDtypeStruct((rows, cols), x.dtype),
        grid_spec=pltpu.PrefetchScalarGridSpec(
            num_scalar_prefetch=0,
            grid=grid,
            in_specs=[
                pl.BlockSpec((tm, tn), lambda i, j: (i, j)),   # x tile
                pl.BlockSpec((tm, 1), lambda i, j: (i, 0)),    # per-row std (f32)
                pl.BlockSpec((tm, 1), lambda i, j: (i, 0)),    # per-row mean (f32)
            ],
            out_specs=pl.BlockSpec((tm, tn), lambda i, j: (i, j)),
        ),
        compiler_params=pltpu.CompilerParams(
            dimension_semantics=("parallel", "parallel"),
            vmem_limit_bytes=vmem_limit,
        ),
        input_output_aliases=({0: 0} if inplace else {}),
    )(x2, std_rows, mean_rows)

    return y2.reshape(N, C, H, W)


if __name__ == "__main__":
    key = jax.random.PRNGKey(0)
    k1, k2, k3 = jax.random.split(key, 3)

    # Case 1: small NCHW f32 input matching the module's implied layout.
    N, C, H, W = 2, 4, 16, 16
    x = jax.random.normal(k1, (N, C, H, W), dtype=jnp.float32)
    mean = jnp.array([0.485, 0.456, 0.406, 0.5], dtype=jnp.float32)
    std = jnp.array([0.229, 0.224, 0.225, 0.25], dtype=jnp.float32)
    y = jax.block_until_ready(unnormalize(x, mean, std))
    y_ref = x * std.reshape(1, -1, 1, 1) + mean.reshape(1, -1, 1, 1)
    assert y.shape == x.shape and y.dtype == x.dtype
    assert jnp.allclose(y, y_ref, atol=1e-6, rtol=1e-6)

    # Case 2: multi-row-block grid where one block spans several channels/batches.
    N2, C2, H2, W2 = 4, 6, 32, 64
    x2 = jax.random.normal(k1, (N2, C2, H2, W2), dtype=jnp.float32)
    mean2 = jax.random.uniform(k2, (C2,), dtype=jnp.float32)
    std2 = jax.random.uniform(k3, (C2,), dtype=jnp.float32) + 0.5
    y2 = jax.block_until_ready(unnormalize(x2, mean2, std2))
    y2_ref = x2 * std2.reshape(1, -1, 1, 1) + mean2.reshape(1, -1, 1, 1)
    assert jnp.allclose(y2, y2_ref, atol=1e-6, rtol=1e-6)

    # Case 3: bf16 input + (1, C, 1, 1)-shaped buffers (as the module stores them);
    # exercises dtype-aware sublane handling and the column-splitting path.
    N3, C3, H3, W3 = 2, 3, 32, 128
    x3 = jax.random.normal(k1, (N3, C3, H3, W3), dtype=jnp.bfloat16)
    mean3 = jnp.array([0.485, 0.456, 0.406], dtype=jnp.float32).reshape(1, C3, 1, 1)
    std3 = jnp.array([0.229, 0.224, 0.225], dtype=jnp.float32).reshape(1, C3, 1, 1)
    y3 = jax.block_until_ready(unnormalize(x3, mean3, std3))
    y3_ref = (x3.astype(jnp.float32) * std3 + mean3).astype(jnp.bfloat16)
    assert y3.shape == x3.shape and y3.dtype == jnp.bfloat16
    assert jnp.allclose(y3.astype(jnp.float32), y3_ref.astype(jnp.float32),
                        atol=2e-2, rtol=2e-2)

    print("KERNEL_OK")
</pallas_src>

<mosaic_0001>
module attributes {stable_mosaic.version = 11 : i64} {
  func.func @_unnormalize_kernel(%arg0: i32, %arg1: i32, %arg2: memref<8x128xf32, #tpu.memory_space<vmem>>, %arg3: memref<8x1xf32, #tpu.memory_space<vmem>>, %arg4: memref<8x1xf32, #tpu.memory_space<vmem>>, %arg5: memref<8x128xf32, #tpu.memory_space<vmem>>) attributes {dimension_semantics = [#tpu.dimension_semantics<parallel>, #tpu.dimension_semantics<parallel>], iteration_bounds = array<i64: 1, 2>, scalar_prefetch = 0 : i64, scratch_operands = 0 : i64, tpu.core_type = #tpu.core_type<tc>, window_params = [{transform_indices = @transform_0, window_bounds = array<i64: 8, 128>}, {transform_indices = @transform_1, window_bounds = array<i64: 8, 1>}, {transform_indices = @transform_2, window_bounds = array<i64: 8, 1>}, {transform_indices = @transform_3, window_bounds = array<i64: 8, 128>}]} {
    %c0 = arith.constant 0 : index
    %c0_0 = arith.constant 0 : index
    %0 = vector.load %arg3[%c0, %c0_0] : memref<8x1xf32, #tpu.memory_space<vmem>>, vector<8x1xf32>
    %c0_1 = arith.constant 0 : index
    %c0_2 = arith.constant 0 : index
    %1 = vector.load %arg4[%c0_1, %c0_2] : memref<8x1xf32, #tpu.memory_space<vmem>>, vector<8x1xf32>
    %c0_3 = arith.constant 0 : index
    %c0_4 = arith.constant 0 : index
    %2 = vector.load %arg2[%c0_3, %c0_4] : memref<8x128xf32, #tpu.memory_space<vmem>>, vector<8x128xf32>
    %3 = vector.broadcast %0 : vector<8x1xf32> to vector<8x128xf32>
    %4 = arith.mulf %2, %3 : vector<8x128xf32>
    %5 = vector.broadcast %1 : vector<8x1xf32> to vector<8x128xf32>
    %6 = arith.addf %4, %5 : vector<8x128xf32>
    %c0_5 = arith.constant 0 : index
    %c0_6 = arith.constant 0 : index
    %7 = vector.load %arg5[%c0_5, %c0_6] : memref<8x128xf32, #tpu.memory_space<vmem>>, vector<8x128xf32>
    tpu.vector_store %arg5[%c0_5, %c0_6], %6 {strides = array<i32>} : memref<8x128xf32, #tpu.memory_space<vmem>>, vector<8x128xf32>,
    return
  }
  func.func @transform_0(%arg0: i32, %arg1: i32) -> (i32, i32) {
    %c0_i32 = arith.constant 0 : i32
    return %arg0, %arg1 : i32, i32
  }
  func.func @transform_1(%arg0: i32, %arg1: i32) -> (i32, i32) {
    %c0_i32 = arith.constant 0 : i32
    %c0_i32_0 = arith.constant 0 : i32
    return %arg0, %c0_i32 : i32, i32
  }
  func.func @transform_2(%arg0: i32, %arg1: i32) -> (i32, i32) {
    %c0_i32 = arith.constant 0 : i32
    %c0_i32_0 = arith.constant 0 : i32
    return %arg0, %c0_i32 : i32, i32
  }
  func.func @transform_3(%arg0: i32, %arg1: i32) -> (i32, i32) {
    %c0_i32 = arith.constant 0 : i32
    return %arg0, %arg1 : i32, i32
  }
}

</mosaic_0001>

<bundles_post_ra>
// kernel: tpu_custom_call.1
= control target key start
LH: loop header
LB: loop body
LE: loop exit
PB: predicated region body
PF: predicated region fallthrough
CT: control target
= control target key end

     0   :  { %8 = vsyncpa [#allocation3], 0  ;;  %s655_s0 = inlined_call_operand.vmem [shape: f32[8,256], index: 0, kind: input, shape index: {}]   ;;  %s656_s1 = inlined_call_operand.vmem [shape: f32[8,1], index: 1, kind: input, shape index: {}]   ;;  %s657_s2 = inlined_call_operand.vmem [shape: f32[8,1], index: 2, kind: input, shape index: {}]   ;;  %s658_s3 = inlined_call_operand.hbm [shape: f32[8,256], index: 3, kind: output, shape index: {}]  }
   0x1   :  { %10 = vsyncpa [#allocation3 + $0x1], 0  ;;  %s537_s12 = smov 0   ;;  %s539_s13 = smov 0  }
   0x2   :  { %s541_s14 = smov 0   ;;  %s543_s15 = smov 0  }
   0x3   :  { %s545_s16 = smov 0   ;;  %s547_s17 = smov 0  }
   0x4 LB: > { %s365_s18 = sadd.s32 4294967295, %s513_s17   ;;  %s366_s19 = sadd.s32 4294967294, %s513_s17   ;;  %s513_s17 = sphi %s547_s17, %s16_s17   ;;  %s509_s16 = sphi %s545_s16, %s665_s16   ;;  %s505_s15 = sphi %s543_s15, %s664_s15   ;;  %s501_s14 = sphi %s541_s14, %s663_s14   ;;  %s497_s13 = sphi %s539_s13, %s662_s13   ;;  %s493_s12 = sphi %s537_s12, %s661_s12  }
   0x5   : > { %s25_s20 = sadd.s32 1, %s509_s16  ;;  %s117_s21 = sadd.s32 1, %s501_s14 }
   0x6   : > { %p26_p0 = scmp.ge.s32.totalorder %s25_s20, 2  ;;  %p127_p1 = scmp.ne.s32.totalorder %s501_s14, %s497_s13 }
   0x7   : > { %p128_p2 = scmp.eq.s32.totalorder %s365_s18, 1  ;;  %p133_p3 = scmp.ne.s32.totalorder %s497_s13, %s493_s12 }
   0x8   : > { %s667_s20 = smov (%p26_p0, %s25_s20), 0  ;;  %p134_p5 = scmp.eq.s32.totalorder %s366_s19, 1 }
   0x9   : > { %p577_p4 = por %p128_p2, %p127_p1  ;;  %s113_s23 = ssub.s32 %s509_s16, %s667_s20 }
   0xa   : > { %p371_p6 = scmp.ge.s32.totalorder %s513_s17, 1  ;;  %p115_p7 = scmp.eq.s32.totalorder %s113_s23, 0 }
   0xb   : > { %p584_p8 = por %p134_p5, %p133_p3  ;;  %p177_p9 = scmp.lt.s32.totalorder %s513_s17, 3 }
   0xc   : > { %s590_s25 = scalar_select %p115_p7, %s501_s14, %s117_s21  }
   0xd   : > { %p178_p10 = pnand %p371_p6, %p177_p9 }
   0xe   : > { %v228_v0 = vld [vmem:[%s656_s1] sm:$0xff] (!%p178_p10)  ;;  %v515_v1 = vmov (!%p178_p10), 0   ;;  %p214_p11 = scmp.lt.s32.totalorder (!%p178_p10), %s505_s15, 1  ;;  %s209_s4 = sand.u32 (!%p178_p10), 1, %s497_s13  }
   0xf   : > { %181 = sbr.rel (%p178_p10) target bundleno = 164 (0xa4), region = 32  ;;  %434 = vset.pattern.permute.xlu0 (!%p178_p10), %v515_v1  ;;  %v229_v2 = vld [vmem:[%s657_s2] sm:$0xff] (!%p178_p10)  ;;  %s372_s6 = sshll.u32 (!%p178_p10), %s209_s4, 3 }
  0x10   : > { %233 = vperm.xlu0 (!%p178_p10), %434, %v228_v0   ;;  %s375_s10 = sshll.u32 (!%p178_p10), %s505_s15, 7  ;;  %s211_s11 = scalar_lea.vmem (!%p178_p10), [#allocation2], %s372_s6 }
  0x11   : > { %s260_s18 = sshll.u32 (!%p178_p10), %s211_s11, 4  ;;  %s608_s23 = scalar_lea.hbm (!%p178_p10), %s658_s3, %s375_s10  ;;  %s610_s18 = int_to_ptr.vmem [resolvable:$true] %s260_s18 }
  0x12   : > { %s245_s26 = scalar_lea.sflag (!%p178_p10), [#allocation3], %s209_s4  ;;  %s435_s27 = scalar_lea.vmem (!%p178_p10), %s610_s18, 128 }
  0x13   : > { %p436_p12 = scmp.ne.s32.totalorder (!%p178_p10), %s610_s18, %s435_s27 }
  0x14   : > { %239 = vperm.xlu0 (!%p178_p10), %434, %v229_v2  }
  0x15   : > { %p437_p13 = pnand (!%p178_p10), %p436_p12, %p577_p4 }
  0x16   : > { %s215_s30 = scalar_select %p214_p11, %s505_s15, 1 }
  0x17   : > { %p438_p0 = pneg %p437_p13  ;;  %s516_s15 = smov [#allocation2]  }
  0x18   : > { %s373_s5 = sshll.u32 %s215_s30, 3  ;;  %s439_s28 = sshll.u32 %s516_s15, 4  ;;  %s440_s28 = int_to_ptr.vmem [resolvable:$false] %s439_s28 }
  0x19   : > { %s219_s9 = scalar_lea.vmem %s655_s0, %s373_s5  ;;  %s441_s29 = scalar_lea.vmem %s440_s28, 256 }
  0x1a   : > { %v230_v4 = vld [vmem:[%s219_s9] sm:$0xff]  ;;  %p442_p1 = scmp.lt.s32.totalorder %s610_s18, %s440_s28  ;;  %p443_p2 = scmp.lt.s32.totalorder %s441_s29, %s435_s27 }
  0x1c   : > { %p444_p3 = por %p443_p2, %p442_p1 }
  0x1e   : > { %p445_p5 = pnand %p444_p3, %p438_p0 }
  0x8f   : > { %v234_v3 = vpop.permute.xlu0 %233 }
  0x90   : > { %v236_v5 = vmul.f32 %v234_v3, %v230_v4 }
  0x93   : > { %v240_v6 = vpop.permute.xlu0 %239 }
  0x94   : > { %v242_v7 = vadd.f32 %v240_v6, %v236_v5 }
  0x96   : > { %243 = vst [vmem:[%s211_s11] sm:$0xff] %v242_v7 }
  0x97   : > { %448 = shalt.err (!%p445_p5)
}
  0x98   : > { %s449_s30 = scalar_lea.hbm %s608_s23, 128  ;;  %s453_s6 = scalar_lea.hbm %s658_s3, 256 }
  0x99   : > { %p450_p6 = scmp.ne.s32.totalorder %s608_s23, %s449_s30  ;;  %p454_p10 = scmp.lt.u32.totalorder %s608_s23, %s658_s3 }
  0x9a   : > { %p455_p11 = scmp.lt.u32.totalorder %s453_s6, %s449_s30  ;;  %p457_p13 = scmp.lt.u32.totalorder %s449_s30, %s608_s23 }
  0x9b   : > { %p451_p7 = pnand %p450_p6, %p577_p4 }
  0x9c   : > { %p456_p12 = por %p455_p11, %p454_p10 }
  0x9d   : > { %p452_p9 = pneg %p451_p7 }
  0x9e   : > { %p458_p0 = por %p457_p13, %p456_p12 }
  0xa0   : > { %p459_p1 = pnand %p458_p0, %p452_p9 }
  0xa2   : > { %462 = shalt.err (!%p459_p1)
}
  0xa3   : > { %378 = dma.vmem_to_hbm [thread:$0]  (%p577_p4), %s610_s18, 128, %s608_s23, %s245_s26  }
  0xa4 PF: > { %p384_p2 = scmp.ge.s32.totalorder %s513_s17, 2  ;;  %s272_s9 = sand.u32 1, %s493_s12  }
  0xa5   : > { %s273_s10 = scalar_lea.sflag [#allocation3], %s272_s9 }
  0xa6   : > { %p381_p3 = pnand %p384_p2, %p584_p8 }
  0xa8   : > { %488 = dma.done.wait (!%p381_p3), %s273_s10, 128  }
  0xa9   : > { %490 = vsyncadd (!%p381_p3), %s273_s10, 4294967168  ;;  %s16_s17 = sadd.s32 1, %s513_s17   ;;  %s661_s12 = smov %s497_s13 }
  0xaa   : > { %p13_p5 = scmp.ge.s32.totalorder %s16_s17, 4   ;;  %s662_s13 = smov %s501_s14 }
  0xab   : > { %s663_s14 = smov %s590_s25  ;;  %s664_s15 = smov %s509_s16 }
  0xac   : > { %s665_s16 = smov %s667_s20  ;;  %15 = sbr.rel (!%p13_p5) target bundleno = 4 (0x4), region = 73 }
  0xb3   :  { %278 = vsyncpa [#allocation3], 1 }
  0xb4   :  { %280 = vsyncpa [#allocation3 + $0x1], 1 }

</bundles_post_ra>
